<compile_context>
chip_gen: v7x
topology: tpu7x:2x2x1
jax: 0.10.0
libtpu: 0.0.40
codegen_flags: <defaults>
</compile_context>

<pallas_src>
import functools

import jax
import jax.numpy as jnp
from jax.experimental import pallas as pl
from jax.experimental.pallas import tpu as pltpu

_LANES = 128


# --------------------------------------------------------------------------- #
# Pooling kernel (streaming global sum / max over the spatial axis)
# --------------------------------------------------------------------------- #
def _accumulate(x_ref, sum_acc, max_acc, limit):
    """Fold the (Bt, Ct, HWt) tile into the lane-shaped (Bt, Ct, 128) accumulators.

    Pure VPU adds/maxes over 128-lane chunks.  `limit` (a static int) is the
    number of valid spatial positions in this tile (None => all valid).  Only
    the single boundary chunk is masked; fully-invalid chunks are skipped at
    trace time, so the common (unmasked) step has no selects and no iota.
    """
    hwt = x_ref.shape[2]                                     # multiple of 128 here
    lane = jax.lax.broadcasted_iota(jnp.int32, (1, 1, _LANES), 2)
    s_part = None
    m_part = None
    for k in range(0, hwt, _LANES):
        if limit is not None and k >= limit:
            break                                            # fully invalid chunk
        chunk = x_ref[:, :, pl.ds(k, _LANES)].astype(jnp.float32)
        if limit is not None and (limit - k) < _LANES:       # boundary chunk only
            mask = lane < (limit - k)
            cs = jnp.where(mask, chunk, 0.0)
            cm = jnp.where(mask, chunk, -jnp.inf)
        else:
            cs = chunk
            cm = chunk
        s_part = cs if s_part is None else s_part + cs
        m_part = cm if m_part is None else jnp.maximum(m_part, cm)
    sum_acc[...] = sum_acc[...] + s_part
    max_acc[...] = jnp.maximum(max_acc[...], m_part)


def _pool_kernel(x_ref, sum_ref, max_ref, *scratch, hw_total, hw_tile, n_hw):
    # x_ref   : (Bt, Ct, HWt) input tile (native dtype, upcast inside)
    # sum_ref : (Bt, Ct) f32 spatial sum      (written on the last HW step)
    # max_ref : (Bt, Ct) f32 spatial max      (written on the last HW step)
    # scratch : () when n_hw == 1, else ((Bt, Ct, 128) sum acc, (Bt, Ct, 128) max acc)
    if n_hw == 1:
        # Whole spatial extent in one tile: reduce directly (single XLU pass,
        # no scratch, no masking — HWt == HW exactly).
        x = x_ref[...].astype(jnp.float32)
        sum_ref[...] = jnp.sum(x, axis=-1)
        max_ref[...] = jnp.max(x, axis=-1)
        return

    sum_acc, max_acc = scratch
    h = pl.program_id(2)

    @pl.when(h == 0)
    def _init():
        sum_acc[...] = jnp.zeros_like(sum_acc)
        max_acc[...] = jnp.full_like(max_acc, -jnp.inf)

    tail = hw_total % hw_tile                                # static
    if tail == 0:
        _accumulate(x_ref, sum_acc, max_acc, None)
    else:
        @pl.when(h < n_hw - 1)
        def _full_tiles():
            _accumulate(x_ref, sum_acc, max_acc, None)       # unmasked hot path

        @pl.when(h == n_hw - 1)
        def _masked_tail():
            _accumulate(x_ref, sum_acc, max_acc, tail)       # masked, last step only

    @pl.when(h == n_hw - 1)
    def _epilogue():
        sum_ref[...] = jnp.sum(sum_acc[...], axis=-1)        # one cross-lane reduce
        max_ref[...] = jnp.max(max_acc[...], axis=-1)


# --------------------------------------------------------------------------- #
# MLP + sigmoid micro-kernel on the pooled (B, C) rows
# --------------------------------------------------------------------------- #
def _mlp_kernel(sum_ref, max_ref, w1t_ref, w2t_ref, out_ref, *, inv_hw):
    avg = sum_ref[...] * jnp.float32(inv_hw)                 # (B, C)
    mx = max_ref[...]                                        # (B, C)

    def mlp(v):
        h = jnp.dot(v, w1t_ref[...], preferred_element_type=jnp.float32)
        h = jnp.maximum(h, 0.0)                              # ReLU
        return jnp.dot(h, w2t_ref[...], preferred_element_type=jnp.float32)

    out_ref[...] = jax.nn.sigmoid(mlp(avg) + mlp(mx)).astype(out_ref.dtype)


# --------------------------------------------------------------------------- #
# Tiling / wrapper
# --------------------------------------------------------------------------- #
def _vmem_capacity_bytes():
    try:
        return int(pltpu.get_tpu_info().vmem_capacity_bytes)
    except Exception:
        return 128 << 20


def _choose_tiles(B, C, HW, itemsize, target_bytes, budget_bytes):
    """Pick (batch, channel, spatial) tiles for the pooling kernel.

    The spatial axis (contiguous, innermost reduction axis) is grown first as a
    multiple of 128 (or the whole extent), preferring sizes that divide HW; the
    channel axis is split only to provide a >=2-extent parallel grid axis when
    the batch cannot; the batch tile grows last (multiples of 8 — the pooled
    outputs are f32, so 8 sublanes is the right granularity).
    """
    bt = B if B <= 8 else 8

    # Channel tile: full C unless batch gives no parallelism and the problem is
    # big enough for a second TensorCore (v7x) to matter.
    ct = C
    if pl.cdiv(B, bt) < 2 and bt * C * HW * itemsize >= (1 << 20):
        cand = ((C // 2) // _LANES) * _LANES
        while cand >= _LANES and C % cand != 0:
            cand -= _LANES
        if cand >= _LANES:
            ct = cand

    # Spatial tile (grown first).
    row_bytes = max(1, bt * ct * itemsize)
    hw_t = max(_LANES, (target_bytes // row_bytes) // _LANES * _LANES)
    if hw_t >= HW:
        hw_t = HW
    else:
        d = hw_t
        while d >= max(_LANES, hw_t // 2):                   # prefer a divisor of HW
            if HW % d == 0:
                hw_t = d
                break
            d -= _LANES

    # Batch tile grows only if the whole spatial extent already fits.
    if hw_t == HW and B > bt:
        blk = bt * ct * hw_t * itemsize
        if blk < target_bytes:
            grow = target_bytes // max(1, ct * hw_t * itemsize)
            bt = max(bt, (grow // 8) * 8)
            bt = B if bt >= B else bt

    # Keep 2x block + lane-shaped accumulators comfortably inside VMEM.
    def need(bt_, ct_):
        blk = bt_ * ct_ * hw_t * itemsize
        scr = 2 * bt_ * ct_ * _LANES * 4 if pl.cdiv(HW, hw_t) > 1 else 0
        return 2 * blk + scr + (4 << 20)

    while need(bt, ct) > budget_bytes:
        if ct > _LANES and ct % (2 * _LANES) == 0 and C % (ct // 2) == 0:
            ct //= 2
        elif bt > 8:
            bt = max(8, ((bt // 2) // 8) * 8)
        else:
            break

    return bt, ct, hw_t


def channel_attention(x, w1, w2):
    """x: (B, C, H, W); w1: (C//ratio, C); w2: (C, C//ratio).
    Returns sigmoid(MLP(avgpool(x)) + MLP(maxpool(x))) of shape (B, C, 1, 1)."""
    B, C, H, W = x.shape
    HW = H * W
    Cr = w1.shape[0]
    itemsize = jnp.dtype(x.dtype).itemsize

    x3 = x.reshape(B, C, HW)                                 # free reshape, native dtype
    w1t = jnp.asarray(w1, jnp.float32).T                     # (C, Cr)
    w2t = jnp.asarray(w2, jnp.float32).T                     # (Cr, C)

    cap = _vmem_capacity_bytes()
    target = (12 << 20) if cap >= (100 << 20) else (6 << 20)   # v5e/v6e vs v7x
    budget = (cap * 3) // 4

    Bt, Ct, HWt = _choose_tiles(B, C, HW, itemsize, target, budget)
    n_b, n_c, n_hw = pl.cdiv(B, Bt), pl.cdiv(C, Ct), pl.cdiv(HW, HWt)

    block_bytes = Bt * Ct * HWt * itemsize
    scratch_shapes = ([pltpu.VMEM((Bt, Ct, _LANES), jnp.float32)] * 2
                      if n_hw > 1 else [])
    scratch_bytes = 2 * Bt * Ct * _LANES * 4 if n_hw > 1 else 0
    vmem_limit = int(min(max(32 << 20, 2 * block_bytes + scratch_bytes + (6 << 20)),
                         budget))

    sum_pool, max_pool = pl.pallas_call(
        functools.partial(_pool_kernel, hw_total=HW, hw_tile=HWt, n_hw=n_hw),
        out_shape=(jax.ShapeDtypeStruct((B, C), jnp.float32),
                   jax.ShapeDtypeStruct((B, C), jnp.float32)),
        grid_spec=pltpu.PrefetchScalarGridSpec(
            num_scalar_prefetch=0,
            grid=(n_b, n_c, n_hw),
            in_specs=[pl.BlockSpec((Bt, Ct, HWt), lambda b, c, h: (b, c, h))],
            out_specs=[pl.BlockSpec((Bt, Ct), lambda b, c, h: (b, c)),
                       pl.BlockSpec((Bt, Ct), lambda b, c, h: (b, c))],
            scratch_shapes=scratch_shapes),
        compiler_params=pltpu.CompilerParams(
            dimension_semantics=("parallel", "parallel", "arbitrary"),
            vmem_limit_bytes=vmem_limit),
        cost_estimate=pl.CostEstimate(
            flops=2 * B * C * HW,                            # sum + max stream
            transcendentals=0,
            bytes_accessed=int(x3.size * itemsize + 2 * B * C * 4)),
    )(x3)

    att = pl.pallas_call(
        functools.partial(_mlp_kernel, inv_hw=1.0 / HW),
        out_shape=jax.ShapeDtypeStruct((B, C), x.dtype),
        in_specs=[pl.BlockSpec(memory_space=pltpu.MemorySpace.VMEM)] * 4,
        out_specs=pl.BlockSpec(memory_space=pltpu.MemorySpace.VMEM),
        cost_estimate=pl.CostEstimate(
            flops=8 * B * C * Cr + 6 * B * C,
            transcendentals=B * C,
            bytes_accessed=int(2 * B * C * 4 + 2 * C * Cr * 4 + B * C * itemsize)),
    )(sum_pool, max_pool, w1t, w2t)

    return att.reshape(B, C, 1, 1)


# --------------------------------------------------------------------------- #
# Pure-JAX reference mirroring the PyTorch forward
# --------------------------------------------------------------------------- #
def channel_attention_ref(x, w1, w2):
    xf = x.astype(jnp.float32)
    avg = jnp.mean(xf, axis=(2, 3))                          # (B, C)
    mx = jnp.max(xf, axis=(2, 3))                            # (B, C)

    def mlp(v):
        h = jnp.maximum(v @ w1.astype(jnp.float32).T, 0.0)   # (B, Cr)
        return h @ w2.astype(jnp.float32).T                  # (B, C)

    out = jax.nn.sigmoid(mlp(avg) + mlp(mx))
    return out[:, :, None, None].astype(x.dtype)


if __name__ == "__main__":
    key = jax.random.PRNGKey(0)

    def run_case(B, C, H, W, ratio, scale, key, tag):
        Cr = max(1, C // ratio)
        kx, k1, k2, key = jax.random.split(key, 4)
        x = jax.random.normal(kx, (B, C, H, W), dtype=jnp.float32)
        w1 = jax.random.normal(k1, (Cr, C), dtype=jnp.float32) * scale
        w2 = jax.random.normal(k2, (C, Cr), dtype=jnp.float32) * scale
        out = jax.block_until_ready(channel_attention(x, w1, w2))
        ref = channel_attention_ref(x, w1, w2)
        assert out.shape == (B, C, 1, 1)
        assert jnp.allclose(out, ref, atol=1e-4, rtol=1e-4), f"mismatch ({tag})"
        return key

    # 1) module-sized case: single-step reduce, whole x in one block
    key = run_case(2, 64, 16, 16, 16, 0.1, key, "small")
    # 2) channel-tiled case: >=2-extent parallel axis (v7x dual-core path)
    key = run_case(2, 256, 60, 60, 16, 0.05, key, "channel-tiled")
    # 3) large spatial: multi-step HW streaming with a masked tail tile
    key = run_case(2, 128, 113, 113, 16, 0.05, key, "hw-tiled+mask")

    print("KERNEL_OK")
</pallas_src>

<mosaic_0001>
module attributes {stable_mosaic.version = 11 : i64} {
  func.func @_pool_kernel(%arg0: i32, %arg1: i32, %arg2: i32, %arg3: memref<2x64x256xf32, #tpu.memory_space<vmem>>, %arg4: memref<2x64xf32, #tpu.memory_space<vmem>>, %arg5: memref<2x64xf32, #tpu.memory_space<vmem>>) attributes {dimension_semantics = [#tpu.dimension_semantics<parallel>, #tpu.dimension_semantics<parallel>, #tpu.dimension_semantics<arbitrary>], iteration_bounds = array<i64: 1, 1, 1>, scalar_prefetch = 0 : i64, scratch_operands = 0 : i64, tpu.core_type = #tpu.core_type<tc>, window_params = [{transform_indices = @transform_0, window_bounds = array<i64: 2, 64, 256>}, {transform_indices = @transform_1, window_bounds = array<i64: 2, 64>}, {transform_indices = @transform_2, window_bounds = array<i64: 2, 64>}]} {
    %c0 = arith.constant 0 : index
    %c0_0 = arith.constant 0 : index
    %c0_1 = arith.constant 0 : index
    %0 = vector.load %arg3[%c0, %c0_0, %c0_1] : memref<2x64x256xf32, #tpu.memory_space<vmem>>, vector<2x64x256xf32>
    %cst = arith.constant dense<0.000000e+00> : vector<2x64xf32>
    %1 = vector.multi_reduction <add>, %0, %cst [2] : vector<2x64x256xf32> to vector<2x64xf32>
    %c0_2 = arith.constant 0 : index
    %c0_3 = arith.constant 0 : index
    %2 = vector.load %arg4[%c0_2, %c0_3] : memref<2x64xf32, #tpu.memory_space<vmem>>, vector<2x64xf32>
    tpu.vector_store %arg4[%c0_2, %c0_3], %1 {strides = array<i32>} : memref<2x64xf32, #tpu.memory_space<vmem>>, vector<2x64xf32>,
    %cst_4 = arith.constant dense<0xFF800000> : vector<2x64xf32>
    %3 = vector.multi_reduction <maximumf>, %0, %cst_4 [2] : vector<2x64x256xf32> to vector<2x64xf32>
    %c0_5 = arith.constant 0 : index
    %c0_6 = arith.constant 0 : index
    %4 = vector.load %arg5[%c0_5, %c0_6] : memref<2x64xf32, #tpu.memory_space<vmem>>, vector<2x64xf32>
    tpu.vector_store %arg5[%c0_5, %c0_6], %3 {strides = array<i32>} : memref<2x64xf32, #tpu.memory_space<vmem>>, vector<2x64xf32>,
    return
  }
  func.func @transform_0(%arg0: i32, %arg1: i32, %arg2: i32) -> (i32, i32, i32) {
    %c0_i32 = arith.constant 0 : i32
    return %arg0, %arg1, %arg2 : i32, i32, i32
  }
  func.func @transform_1(%arg0: i32, %arg1: i32, %arg2: i32) -> (i32, i32) {
    %c0_i32 = arith.constant 0 : i32
    return %arg0, %arg1 : i32, i32
  }
  func.func @transform_2(%arg0: i32, %arg1: i32, %arg2: i32) -> (i32, i32) {
    %c0_i32 = arith.constant 0 : i32
    return %arg0, %arg1 : i32, i32
  }
}

</mosaic_0001>

<bundles_post_ra>
// kernel: tpu_custom_call.1
= control target key start
LH: loop header
LB: loop body
LE: loop exit
PB: predicated region body
PF: predicated region fallthrough
CT: control target
= control target key end

     0   :  { %8 = vsyncpa [#allocation3], 0  ;;  %s662_s0 = inlined_call_operand.hbm [shape: f32[2,64,256], index: 0, kind: input, shape index: {}]   ;;  %s663_s1 = inlined_call_operand.hbm [shape: f32[2,64], index: 1, kind: output, shape index: {0}]   ;;  %s664_s2 = inlined_call_operand.hbm [shape: f32[2,64], index: 2, kind: output, shape index: {1}]  }
   0x1   :  { %9 = vsyncpa [#allocation4], 0 }
   0x2   :  { %10 = vsyncpa [#allocation7], 0  ;;  %s472_s9 = smov [#allocation2]   ;;  %s400_s13 = scalar_lea.hbm %s662_s0, 4096 }
   0x3   :  { %s16_s10 = sshll.u32 %s472_s9, 4  ;;  %p401_p0 = scmp.ne.s32.totalorder %s662_s0, %s400_s13  ;;  %s17_s10 = int_to_ptr.vmem [resolvable:$true] %s16_s10 }
   0x4   :  { %p404_p1 = scmp.lt.u32.totalorder %s400_s13, %s662_s0 }
   0x6   :  { %p406_p2 = pnand %p404_p1, %p401_p0 }
   0x8   :  { %409 = shalt.err (!%p406_p2)
}
   0x9   :  { %s410_s18 = scalar_lea.vmem %s17_s10, 4096  ;;  %p415_p4 = scmp.lt.s32.totalorder %s17_s10, %s17_s10 }
   0xa   :  { %p411_p3 = scmp.ne.s32.totalorder %s17_s10, %s410_s18  ;;  %p416_p5 = scmp.lt.s32.totalorder %s410_s18, %s410_s18 }
   0xc   :  { %p417_p6 = por %p416_p5, %p415_p4 }
   0xe   :  { %p418_p7 = pnand %p417_p6, %p411_p3 }
  0x10   :  { %421 = shalt.err (!%p418_p7)
}
  0x11   :  { %s473_s19 = smov 256   ;;  %s474_s20 = smov 16  }
  0x12   :  { %22 = dma.hbm_to_vmem [thread:$0]  %s662_s0, 4096, %s17_s10, [#allocation3], %s473_s19, %s473_s19, %s474_s20  }
  0x13   :  { %466 = dma.done.wait [#allocation3], 4096  }
  0x14   :  { %467 = vsyncadd [#allocation3], 4294963200  ;;  %v42_v0 = vld [vmem:[#allocation2 + $0x80] sm:$0xff]  ;;  %v43_v1 = vld [vmem:[#allocation2 + $0x88] sm:$0xff]  ;;  %vm133_vm0 = vcmask 130112   ;;  %vm140_vm1 = vcmask 195712  }
  0x15   :  { %v26_v2 = vld [vmem:[#allocation2] sm:$0xff]  ;;  %v82_v3 = vadd.f32 %v43_v1, %v42_v0  ;;  %v27_v4 = vld [vmem:[#allocation2 + $0x8] sm:$0xff]  ;;  %v44_v5 = vld [vmem:[#allocation2 + $0x90] sm:$0xff]  ;;  %v245_v15 = vmax.f32 %v42_v0, %v43_v1  ;;  %vm147_vm2 = vcmask 261312   ;;  %vm154_vm3 = vcmask 326912   ;;  %s475_s0 = smov [#allocation5]  }
  0x16   :  { %v45_v6 = vld [vmem:[#allocation2 + $0x98] sm:$0xff]  ;;  %v58_v7 = vadd.f32 %v27_v4, %v26_v2  ;;  %v28_v8 = vld [vmem:[#allocation2 + $0x10] sm:$0xff]  ;;  %v221_v13 = vmax.f32 %v26_v2, %v27_v4  ;;  %v46_v16 = vld [vmem:[#allocation2 + $0xa0] sm:$0xff]  ;;  %vm161_vm4 = vcmask 392512   ;;  %vm168_vm5 = vcmask 458112   ;;  %s372_s23 = sshll.u32 %s475_s0, 4  ;;  %s373_s23 = int_to_ptr.vmem [resolvable:$true] %s372_s23 }
  0x17   :  { %v29_v9 = vld [vmem:[#allocation2 + $0x18] sm:$0xff]  ;;  %83 = vadd.xlane.f32.xlu1 %v82_v3  ;;  %v85_v10 = vadd.f32 %v45_v6, %v44_v5  ;;  %v248_v14 = vmax.f32 %v44_v5, %v45_v6  ;;  %v47_v17 = vld [vmem:[#allocation2 + $0xa8] sm:$0xff]  ;;  %v30_v18 = vld [vmem:[#allocation2 + $0x20] sm:$0xff]  ;;  %vm175_vm6 = vcmask 523712   ;;  %vm216_vm7 = vcmask 1041409   ;;  %s476_s24 = smov [#allocation6]   ;;  %p427_p9 = scmp.lt.s32.totalorder %s373_s23, %s373_s23 }
  0x18   :  { %59 = vadd.xlane.f32.xlu0 %v58_v7  ;;  %v61_v11 = vadd.f32 %v29_v9, %v28_v8  ;;  %v224_v12 = vmax.f32 %v28_v8, %v29_v9  ;;  %v31_v19 = vld [vmem:[#allocation2 + $0x28] sm:$0xff]  ;;  %v88_v20 = vadd.f32 %v47_v17, %v46_v16  ;;  %v251_v22 = vmax.f32 %v46_v16, %v47_v17  ;;  %v48_v24 = vld [vmem:[#allocation2 + $0xb0] sm:$0xff]  ;;  %v49_v25 = vld [vmem:[#allocation2 + $0xb8] sm:$0xff]  ;;  %s382_s25 = sshll.u32 %s476_s24, 4  ;;  %s422_s26 = scalar_lea.vmem %s373_s23, 32  ;;  %s383_s25 = int_to_ptr.vmem [resolvable:$true] %s382_s25 }
  0x19   :  { %v64_v21 = vadd.f32 %v31_v19, %v30_v18  ;;  %v227_v23 = vmax.f32 %v30_v18, %v31_v19  ;;  %v32_v26 = vld [vmem:[#allocation2 + $0x30] sm:$0xff]  ;;  %v33_v27 = vld [vmem:[#allocation2 + $0x38] sm:$0xff]  ;;  %v91_v28 = vadd.f32 %v49_v25, %v48_v24  ;;  %v254_v30 = vmax.f32 %v48_v24, %v49_v25  ;;  %v50_v32 = vld [vmem:[#allocation2 + $0xc0] sm:$0xff]  ;;  %p423_p8 = scmp.ne.s32.totalorder %s373_s23, %s422_s26  ;;  %p428_p10 = scmp.lt.s32.totalorder %s422_s26, %s422_s26 }
  0x1a   :  { %v67_v29 = vadd.f32 %v33_v27, %v32_v26  ;;  %v230_v31 = vmax.f32 %v32_v26, %v33_v27  ;;  %v51_v33 = vld [vmem:[#allocation2 + $0xc8] sm:$0xff]  ;;  %v34_v34 = vld [vmem:[#allocation2 + $0x40] sm:$0xff]  ;;  %v52_v40 = vld [vmem:[#allocation2 + $0xd0] sm:$0xff]  ;;  %v122_v17 = vlaneseq  ;;  %vm219_vm8 = vcmask 517120  }
  0x1b   :  { %86 = vadd.xlane.f32.xlu1 %v85_v10  ;;  %v35_v35 = vld [vmem:[#allocation2 + $0x48] sm:$0xff]  ;;  %v94_v36 = vadd.f32 %v51_v33, %v50_v32  ;;  %v257_v38 = vmax.f32 %v50_v32, %v51_v33  ;;  %v53_v41 = vld [vmem:[#allocation2 + $0xd8] sm:$0xff]  ;;  %v36_v42 = vld [vmem:[#allocation2 + $0x50] sm:$0xff]  ;;  %p429_p11 = por %p428_p10, %p427_p9 }
  0x1c   :  { %62 = vadd.xlane.f32.xlu0 %v61_v11  ;;  %v70_v37 = vadd.f32 %v35_v35, %v34_v34  ;;  %v233_v39 = vmax.f32 %v34_v34, %v35_v35  ;;  %v37_v43 = vld [vmem:[#allocation2 + $0x58] sm:$0xff]  ;;  %v97_v44 = vadd.f32 %v53_v41, %v52_v40  ;;  %v260_v46 = vmax.f32 %v52_v40, %v53_v41  ;;  %v54_v48 = vld [vmem:[#allocation2 + $0xe0] sm:$0xff]  ;;  %v55_v49 = vld [vmem:[#allocation2 + $0xe8] sm:$0xff] }
  0x1d   :  { %v73_v45 = vadd.f32 %v37_v43, %v36_v42  ;;  %v236_v47 = vmax.f32 %v36_v42, %v37_v43  ;;  %v38_v50 = vld [vmem:[#allocation2 + $0x60] sm:$0xff]  ;;  %v39_v51 = vld [vmem:[#allocation2 + $0x68] sm:$0xff]  ;;  %v100_v52 = vadd.f32 %v55_v49, %v54_v48  ;;  %v263_v54 = vmax.f32 %v54_v48, %v55_v49  ;;  %v56_v56 = vld [vmem:[#allocation2 + $0xf0] sm:$0xff]  ;;  %p430_p12 = pnand %p429_p11, %p423_p8 }
  0x1e   :  { %v76_v53 = vadd.f32 %v39_v51, %v38_v50  ;;  %v239_v55 = vmax.f32 %v38_v50, %v39_v51  ;;  %v57_v57 = vld [vmem:[#allocation2 + $0xf8] sm:$0xff]  ;;  %v40_v58 = vld [vmem:[#allocation2 + $0x70] sm:$0xff] }
  0x1f   :  { %225 = vmax.xlane.f32.xlu1 %v224_v12  ;;  %v41_v59 = vld [vmem:[#allocation2 + $0x78] sm:$0xff]  ;;  %v103_v60 = vadd.f32 %v57_v57, %v56_v56  ;;  %v266_v62 = vmax.f32 %v56_v56, %v57_v57 }
  0x20   :  { %222 = vmax.xlane.f32.xlu0 %v221_v13  ;;  %v79_v61 = vadd.f32 %v41_v59, %v40_v58  ;;  %v242_v63 = vmax.f32 %v40_v58, %v41_v59 }
  0x23   :  { %249 = vmax.xlane.f32.xlu1 %v248_v14 }
  0x24   :  { %246 = vmax.xlane.f32.xlu0 %v245_v15 }
  0x27   :  { %89 = vadd.xlane.f32.xlu1 %v88_v20  ;;  %v123_v20 = vand.u32 127, %v122_v17 }
  0x28   :  { %65 = vadd.xlane.f32.xlu0 %v64_v21 }
  0x29   :  { %v135_v24 = vadd.s32 4294967280, %v123_v20  ;;  %v142_v26 = vadd.s32 4294967272, %v123_v20  ;;  %v149_v27 = vadd.s32 4294967264, %v123_v20  ;;  %v170_v32 = vadd.s32 4294967240, %v123_v20 }
  0x2b   :  { %252 = vmax.xlane.f32.xlu1 %v251_v22  ;;  %v128_v22 = vadd.s32 4294967288, %v123_v20 }
  0x2c   :  { %228 = vmax.xlane.f32.xlu0 %v227_v23  ;;  %v125_v23 = vshrl.u32 %v122_v17, 7 }
  0x2e   :  { %v126_v33 = vsub.s32 %v123_v20, %v125_v23  ;;  %v138_v34 = vsub.s32 %v135_v24, %v125_v23  ;;  %v562_v43 = vsub.s32 %v170_v32, %v125_v23 }
  0x2f   :  { %92 = vadd.xlane.f32.xlu1 %v91_v28 }
  0x30   :  { %68 = vadd.xlane.f32.xlu0 %v67_v29  ;;  %v156_v29 = vadd.s32 4294967256, %v123_v20 }
  0x33   :  { %255 = vmax.xlane.f32.xlu1 %v254_v30  ;;  %v163_v30 = vadd.s32 4294967248, %v123_v20 }
  0x34   :  { %231 = vmax.xlane.f32.xlu0 %v230_v31  ;;  %v131_v31 = vsub.s32 %v128_v22, %v125_v23 }
  0x35   :  { %v558_v40 = vsub.s32 %v163_v30, %v125_v23 }
  0x37   :  { %95 = vadd.xlane.f32.xlu1 %v94_v36  ;;  %v550_v36 = vsub.s32 %v142_v26, %v125_v23 }
  0x38   :  { %71 = vadd.xlane.f32.xlu0 %v70_v37  ;;  %v552_v37 = vsub.s32 %v149_v27, %v125_v23 }
  0x3b   :  { %258 = vmax.xlane.f32.xlu1 %v257_v38 }
  0x3c   :  { %234 = vmax.xlane.f32.xlu0 %v233_v39  ;;  %v556_v39 = vsub.s32 %v156_v29, %v125_v23 }
  0x3f   :  { %98 = vadd.xlane.f32.xlu1 %v97_v44 }
  0x40   :  { %74 = vadd.xlane.f32.xlu0 %v73_v45 }
  0x43   :  { %261 = vmax.xlane.f32.xlu1 %v260_v46 }
  0x44   :  { %237 = vmax.xlane.f32.xlu0 %v236_v47 }
  0x47   :  { %101 = vadd.xlane.f32.xlu1 %v100_v52 }
  0x48   :  { %77 = vadd.xlane.f32.xlu0 %v76_v53 }
  0x4b   :  { %264 = vmax.xlane.f32.xlu1 %v263_v54 }
  0x4c   :  { %240 = vmax.xlane.f32.xlu0 %v239_v55 }
  0x4f   :  { %104 = vadd.xlane.f32.xlu1 %v103_v60 }
  0x50   :  { %80 = vadd.xlane.f32.xlu0 %v79_v61 }
  0x53   :  { %267 = vmax.xlane.f32.xlu1 %v266_v62 }
  0x54   :  { %243 = vmax.xlane.f32.xlu0 %v242_v63 }
  0xa4   :  { %v504_v0 = vpop.xlane.xlu1 %83 }
  0xa5   :  { %v506_v1 = vpop.xlane.xlu0 %59  ;;  %v180_v49 = vrot.slane %v504_v0, %v126_v33 }
  0xa6   :  { %v127_v50 = vrot.slane %v506_v1, %v126_v33 }
  0xa8   :  { %v508_v2 = vpop.xlane.xlu1 %86 }
  0xa9   :  { %v510_v3 = vpop.xlane.xlu0 %62  ;;  %v184_v41 = vrot.slane %v508_v2, %v131_v31 }
  0xaa   :  { %v132_v42 = vrot.slane %v510_v3, %v131_v31 }
  0xab   :  { %v185_v57 = vsel %vm133_vm0, %v184_v41, %v180_v49 }
  0xac   :  { %v512_v4 = vpop.xlane.xlu1 %225  ;;  %v134_v58 = vsel %vm133_vm0, %v132_v42, %v127_v50 }
  0xad   :  { %v514_v5 = vpop.xlane.xlu0 %222  ;;  %v292_v44 = vrot.slane %v512_v4, %v131_v31 }
  0xae   :  { %v288_v45 = vrot.slane %v514_v5, %v126_v33 }
  0xb0   :  { %v516_v6 = vpop.xlane.xlu1 %249  ;;  %v293_v60 = vsel %vm133_vm0, %v292_v44, %v288_v45 }
  0xb1   :  { %v518_v7 = vpop.xlane.xlu0 %246  ;;  %v331_v46 = vrot.slane %v516_v6, %v131_v31 }
  0xb2   :  { %v327_v47 = vrot.slane %v518_v7, %v126_v33 }
  0xb4   :  { %v520_v8 = vpop.xlane.xlu1 %89  ;;  %v332_v61 = vsel %vm133_vm0, %v331_v46, %v327_v47 }
  0xb5   :  { %v522_v9 = vpop.xlane.xlu0 %65  ;;  %v189_v51 = vrot.slane %v520_v8, %v138_v34 }
  0xb6   :  { %v139_v52 = vrot.slane %v522_v9, %v138_v34 }
  0xb7   :  { %v190_v1 = vsel %vm140_vm1, %v189_v51, %v185_v57 }
  0xb8   :  { %v524_v10 = vpop.xlane.xlu1 %252  ;;  %v141_v2 = vsel %vm140_vm1, %v139_v52, %v134_v58 }
  0xb9   :  { %v526_v11 = vpop.xlane.xlu0 %228  ;;  %v336_v54 = vrot.slane %v524_v10, %v138_v34 }
  0xba   :  { %v297_v55 = vrot.slane %v526_v11, %v138_v34 }
  0xbb   :  { %v337_v6 = vsel %vm140_vm1, %v336_v54, %v332_v61 }
  0xbc   :  { %v528_v12 = vpop.xlane.xlu1 %92  ;;  %v298_v7 = vsel %vm140_vm1, %v297_v55, %v293_v60 }
  0xbd   :  { %v530_v13 = vpop.xlane.xlu0 %68  ;;  %v194_v56 = vrot.slane %v528_v12, %v550_v36 }
  0xbe   :  { %v146_v59 = vrot.slane %v530_v13, %v550_v36 }
  0xbf   :  { %v195_v8 = vsel %vm147_vm2, %v194_v56, %v190_v1 }
  0xc0   :  { %v532_v14 = vpop.xlane.xlu1 %255  ;;  %v148_v10 = vsel %vm147_vm2, %v146_v59, %v141_v2 }
  0xc1   :  { %v534_v15 = vpop.xlane.xlu0 %231  ;;  %v341_v11 = vrot.slane %v532_v14, %v550_v36 }
  0xc2   :  { %v302_v12 = vrot.slane %v534_v15, %v550_v36 }
  0xc4   :  { %v536_v16 = vpop.xlane.xlu1 %95  ;;  %v303_v32 = vsel %vm147_vm2, %v302_v12, %v298_v7 }
  0xc5   :  { %v538_v18 = vpop.xlane.xlu0 %71  ;;  %v199_v62 = vrot.slane %v536_v16, %v552_v37 }
  0xc6   :  { %v153_v63 = vrot.slane %v538_v18, %v552_v37 }
  0xc7   :  { %v200_v16 = vsel %vm154_vm3, %v199_v62, %v195_v8 }
  0xc8   :  { %v540_v19 = vpop.xlane.xlu1 %258  ;;  %v155_v17 = vsel %vm154_vm3, %v153_v63, %v148_v10 }
  0xc9   :  { %v542_v21 = vpop.xlane.xlu0 %234  ;;  %v346_v18 = vrot.slane %v540_v19, %v552_v37 }
  0xca   :  { %v307_v20 = vrot.slane %v542_v21, %v552_v37 }
  0xcc   :  { %v544_v25 = vpop.xlane.xlu1 %98  ;;  %v308_v36 = vsel %vm154_vm3, %v307_v20, %v303_v32 }
  0xcd   :  { %v546_v28 = vpop.xlane.xlu0 %74  ;;  %v204_v3 = vrot.slane %v544_v25, %v556_v39 }
  0xce   :  { %v160_v4 = vrot.slane %v546_v28, %v556_v39  ;;  %v342_v28 = vsel %vm147_vm2, %v341_v11, %v337_v6 }
  0xcf   :  { %v205_v23 = vsel %vm161_vm4, %v204_v3, %v200_v16  ;;  %v347_v33 = vsel %vm154_vm3, %v346_v18, %v342_v28 }
  0xd0   :  { %v548_v35 = vpop.xlane.xlu1 %261  ;;  %v162_v14 = vsel %vm161_vm4, %v160_v4, %v155_v17 }
  0xd1   :  { %v554_v38 = vpop.xlane.xlu0 %237  ;;  %v351_v15 = vrot.slane %v548_v35, %v556_v39 }
  0xd2   :  { %v312_v26 = vrot.slane %v554_v38, %v556_v39 }
  0xd3   :  { %v352_v37 = vsel %vm161_vm4, %v351_v15, %v347_v33 }
  0xd4   :  { %v102_v48 = vpop.xlane.xlu1 %101 }
  0xd5   :  { %v78_v53 = vpop.xlane.xlu0 %77  ;;  %v209_v9 = vrot.slane %v102_v48, %v558_v40 }
  0xd6   :  { %v167_v13 = vrot.slane %v78_v53, %v558_v40 }
  0xd7   :  { %v210_v19 = vsel %vm168_vm5, %v209_v9, %v205_v23 }
  0xd8   :  { %v265_v0 = vpop.xlane.xlu1 %264  ;;  %v169_v29 = vsel %vm168_vm5, %v167_v13, %v162_v14 }
  0xd9   :  { %v241_v5 = vpop.xlane.xlu0 %240  ;;  %v356_v21 = vrot.slane %v265_v0, %v558_v40 }
  0xda   :  { %v317_v30 = vrot.slane %v241_v5, %v558_v40  ;;  %v313_v40 = vsel %vm161_vm4, %v312_v26, %v308_v36 }
  0xdb   :  { %v357_v42 = vsel %vm168_vm5, %v356_v21, %v352_v37 }
  0xdc   :  { %v105_v22 = vpop.xlane.xlu1 %104  ;;  %v318_v45 = vsel %vm168_vm5, %v317_v30, %v313_v40 }
  0xdd   :  { %v214_v24 = vrot.slane %v105_v22, %v562_v43  ;;  %v81_v25 = vpop.xlane.xlu0 %80 }
  0xde   :  { %v174_v27 = vrot.slane %v81_v25, %v562_v43 }
  0xdf   :  { %v215_v31 = vsel %vm175_vm6, %v214_v24, %v210_v19 }
  0xe0   :  { %v176_v34 = vsel %vm175_vm6, %v174_v27, %v169_v29  ;;  %v268_v35 = vpop.xlane.xlu1 %267 }
  0xe1   :  { %v361_v38 = vrot.slane %v268_v35, %v562_v43  ;;  %v244_v39 = vpop.xlane.xlu0 %243  ;;  %v217_v41 = vsel %vm216_vm7, %v215_v31, %v176_v34 }
  0xe2   :  { %v322_v44 = vrot.slane %v244_v39, %v562_v43  ;;  %220 = vst.msk [vmem:[#allocation5] sm:$0x3] %vm219_vm8, %v217_v41 }
  0xe3   :  { %v362_v46 = vsel %vm175_vm6, %v361_v38, %v357_v42 }
  0xe4   :  { %433 = shalt.err (!%p430_p12)
}
  0xe5   :  { %s434_s29 = scalar_lea.hbm %s663_s1, 32 }
  0xe6   :  { %p435_p13 = scmp.ne.s32.totalorder %s663_s1, %s434_s29  ;;  %p438_p0 = scmp.lt.u32.totalorder %s434_s29, %s663_s1 }
  0xe8   :  { %p440_p1 = pnand %p438_p0, %p435_p13 }
  0xea   :  { %443 = shalt.err (!%p440_p1)
}
  0xeb   :  { %375 = dma.vmem_to_hbm [thread:$0]  %s373_s23, 32, %s663_s1, [#allocation4]   ;;  %v323_v43 = vsel %vm175_vm6, %v322_v44, %v318_v45 }
  0xec   :  { %v363_v47 = vsel %vm216_vm7, %v362_v46, %v323_v43  ;;  %s444_s8 = scalar_lea.vmem %s383_s25, 32  ;;  %p449_p3 = scmp.lt.s32.totalorder %s383_s25, %s383_s25 }
  0xed   :  { %365 = vst.msk [vmem:[#allocation6] sm:$0x3] %vm219_vm8, %v363_v47  ;;  %p445_p2 = scmp.ne.s32.totalorder %s383_s25, %s444_s8  ;;  %p450_p4 = scmp.lt.s32.totalorder %s444_s8, %s444_s8 }
  0xef   :  { %p451_p5 = por %p450_p4, %p449_p3 }
  0xf1   :  { %p452_p6 = pnand %p451_p5, %p445_p2 }
  0xf3   :  { %455 = shalt.err (!%p452_p6)
}
  0xf4   :  { %s456_s11 = scalar_lea.hbm %s664_s2, 32 }
  0xf5   :  { %p457_p7 = scmp.ne.s32.totalorder %s664_s2, %s456_s11  ;;  %p460_p8 = scmp.lt.u32.totalorder %s456_s11, %s664_s2 }
  0xf7   :  { %p462_p9 = pnand %p460_p8, %p457_p7 }
  0xf9   :  { %465 = shalt.err (!%p462_p9)
}
  0xfa   :  { %385 = dma.vmem_to_hbm [thread:$0]  %s383_s25, 32, %s664_s2, [#allocation7]  }
  0xfb   :  { %468 = dma.done.wait [#allocation4], 32  }
  0xfc   :  { %469 = vsyncadd [#allocation4], 4294967264 }
  0xfd   :  { %470 = dma.done.wait [#allocation7], 32  }
  0xfe   :  { %471 = vsyncadd [#allocation7], 4294967264 }
  0xff   :  { %392 = vsyncpa [#allocation3], 1 }
 0x100   :  { %393 = vsyncpa [#allocation4], 1 }
 0x101   :  { %394 = vsyncpa [#allocation7], 1 }

</bundles_post_ra>
